<compile_context>
chip_gen: v6e
topology: v6e:2x2x1
jax: 0.10.0
libtpu: 0.0.40
codegen_flags: <defaults>
</compile_context>

<pallas_src>
import math

import jax
import jax.numpy as jnp
from jax import lax
from jax.experimental import pallas as pl
from jax.experimental.pallas import tpu as pltpu

LANES = 128
MAX_TILE_ROWS = 2048   # 2048 * 128 * 4 B = 1 MiB per input tile
NSPLIT = 2             # leading "parallel" grid axis (v7x has 2 TensorCores)


def _cdiv(a, b):
    return -(-a // b)


def _round_up(a, b):
    return _cdiv(a, b) * b


# ---------------------------------------------------------------------------
# Pallas kernel: sum(|x - y|) over a (rows, 128) slab.
# Grid = (NSPLIT, tiles_per_split); axis 1 is the sequential reduction axis.
# ---------------------------------------------------------------------------
def _abs_diff_sum_kernel(x_ref, y_ref, out_ref, acc_ref):
    i = pl.program_id(1)

    @pl.when(i == 0)
    def _init():
        acc_ref[...] = jnp.zeros_like(acc_ref)

    d = x_ref[...].astype(jnp.float32) - y_ref[...].astype(jnp.float32)
    acc_ref[...] += jnp.abs(d)          # vector accumulator: VALU adds only

    @pl.when(i == pl.num_programs(1) - 1)
    def _finalize():
        # Single cross-lane reduce per split; result splatted into this
        # split's output block (wrapper reads one element per split).
        s = jnp.sum(acc_ref[...])
        out_ref[...] = jnp.full(out_ref.shape, s, dtype=out_ref.dtype)


def _abs_diff_sum(x, y):
    """sum(|x - y|) over all elements, computed with a Pallas TPU kernel."""
    assert x.shape == y.shape
    n = x.size
    xf = jnp.ravel(x)
    yf = jnp.ravel(y)

    rows = _cdiv(n, LANES)
    tile_rows = min(MAX_TILE_ROWS, _round_up(_cdiv(rows, NSPLIT), 8))
    tiles_per_split = _cdiv(rows, NSPLIT * tile_rows)
    total_rows = NSPLIT * tiles_per_split * tile_rows

    # Zero padding is exact for an L1 sum (|0 - 0| == 0), so no in-kernel
    # masking is required.  Only pad when the flat length is not already a
    # multiple of the slab size.
    pad = total_rows * LANES - n
    if pad:
        xf = jnp.pad(xf, (0, pad))
        yf = jnp.pad(yf, (0, pad))
    x2 = xf.reshape(total_rows, LANES)
    y2 = yf.reshape(total_rows, LANES)

    in_map = lambda c, i: (c * tiles_per_split + i, 0)

    partials = pl.pallas_call(
        _abs_diff_sum_kernel,
        out_shape=jax.ShapeDtypeStruct((NSPLIT, 8, LANES), jnp.float32),
        grid_spec=pltpu.PrefetchScalarGridSpec(
            num_scalar_prefetch=0,
            grid=(NSPLIT, tiles_per_split),
            in_specs=[
                pl.BlockSpec((tile_rows, LANES), in_map),
                pl.BlockSpec((tile_rows, LANES), in_map),
            ],
            out_specs=pl.BlockSpec((1, 8, LANES), lambda c, i: (c, 0, 0)),
            scratch_shapes=[pltpu.VMEM((tile_rows, LANES), jnp.float32)],
        ),
        compiler_params=pltpu.CompilerParams(
            dimension_semantics=("parallel", "arbitrary")),
    )(x2, y2)
    # One scalar per split (the block is a splat of that scalar).
    return jnp.sum(partials[:, 0, 0])


# ---------------------------------------------------------------------------
# Module pieces that have no Pallas equivalent (kept in plain JAX / XLA).
# ---------------------------------------------------------------------------
def _img_to_divisible(img, factor):
    # TODO(synk): imgtoDivisible is not defined in the reference snippet; we
    # crop H and W down to the nearest multiple of `factor`.
    h, w = img.shape[-2], img.shape[-1]
    return img[..., : (h // factor) * factor, : (w // factor) * factor]


def _conv_gauss(img):
    """Depthwise 5x5 binomial (Gaussian) blur with reflect padding."""
    c = img.shape[1]
    g = jnp.array([1.0, 4.0, 6.0, 4.0, 1.0], dtype=img.dtype) / 16.0
    k2d = jnp.outer(g, g)                               # sums to 1
    kernel = jnp.broadcast_to(k2d, (c, 1, 5, 5))
    padded = jnp.pad(img, ((0, 0), (0, 0), (2, 2), (2, 2)), mode="reflect")
    return lax.conv_general_dilated(
        padded, kernel, window_strides=(1, 1), padding="VALID",
        dimension_numbers=("NCHW", "OIHW", "NCHW"),
        feature_group_count=c)


def _gau_pyramid(img, max_levels):
    # TODO(synk): gau_pyramid is not defined in the reference snippet; this is
    # the standard Gaussian pyramid (level 0 = input, then blur + 2x decimate).
    pyr = [img]
    current = img
    for _ in range(max_levels - 1):
        current = _conv_gauss(current)[:, :, ::2, ::2]
        pyr.append(current)
    return pyr


def _rfft2_stack(x):
    f = jnp.fft.rfft2(x, axes=(-2, -1))
    return jnp.stack([jnp.real(f), jnp.imag(f)], axis=-1)


# ---------------------------------------------------------------------------
# pramidFrequencyLoss.forward equivalent.
# ---------------------------------------------------------------------------
def pyramid_frequency_loss(x, target, factor, max_levels,
                           loss_weight=1.0, reduction="mean"):
    if reduction not in ("mean", "sum"):
        raise ValueError(f"unsupported reduction: {reduction}")

    x = _img_to_divisible(x, factor)
    target = _img_to_divisible(target, factor)
    pyr_x = _gau_pyramid(x, max_levels)
    pyr_t = _gau_pyramid(target, max_levels)

    # Faithful to the reference forward: x_fft / target_fft are overwritten on
    # every loop iteration, so only the LAST pyramid level's FFT survives; the
    # criterion is then applied to x_fft[i] for i in range(max_levels), i.e.
    # indexed along the batch dimension (requires max_levels <= batch size).
    x_fft = _rfft2_stack(pyr_x[max_levels - 1])
    t_fft = _rfft2_stack(pyr_t[max_levels - 1])
    if x_fft.shape[0] < max_levels:
        raise ValueError("max_levels must be <= batch size (as in the reference)")

    x_sel = x_fft[:max_levels]
    t_sel = t_fft[:max_levels]

    total = _abs_diff_sum(x_sel, t_sel)            # Pallas kernel
    if reduction == "mean":
        per_term = math.prod(x_fft.shape[1:])      # elements in each x_fft[i]
        return total * jnp.float32(loss_weight / per_term)
    return total * jnp.float32(loss_weight)


def _reference(x, target, factor, max_levels, loss_weight=1.0):
    x = _img_to_divisible(x, factor)
    target = _img_to_divisible(target, factor)
    pyr_x = _gau_pyramid(x, max_levels)
    pyr_t = _gau_pyramid(target, max_levels)
    x_fft = _rfft2_stack(pyr_x[max_levels - 1])
    t_fft = _rfft2_stack(pyr_t[max_levels - 1])
    loss = jnp.float32(0.0)
    for i in range(max_levels):
        loss = loss + loss_weight * jnp.mean(jnp.abs(x_fft[i] - t_fft[i]))
    return loss


if __name__ == "__main__":
    key = jax.random.PRNGKey(0)
    kx, ky = jax.random.split(key)
    # NCHW inputs, consistent with the PyTorch module's typical usage.
    x = jax.random.normal(kx, (2, 4, 16, 16), dtype=jnp.float32)
    y = jax.random.normal(ky, (2, 4, 16, 16), dtype=jnp.float32)
    factor, max_levels = 4, 2

    loss = pyramid_frequency_loss(x, y, factor, max_levels, loss_weight=1.0)
    jax.block_until_ready(loss)

    ref = _reference(x, y, factor, max_levels, loss_weight=1.0)
    assert jnp.allclose(loss, ref, rtol=1e-4, atol=1e-5), (loss, ref)
    print("KERNEL_OK")
</pallas_src>

<mosaic_0001>
module attributes {stable_mosaic.version = 11 : i64} {
  func.func @_abs_diff_sum_kernel(%arg0: i32, %arg1: i32, %arg2: memref<8x128xf32, #tpu.memory_space<vmem>>, %arg3: memref<8x128xf32, #tpu.memory_space<vmem>>, %arg4: memref<1x8x128xf32, #tpu.memory_space<vmem>>, %arg5: memref<8x128xf32, #tpu.memory_space<vmem>>) attributes {dimension_semantics = [#tpu.dimension_semantics<parallel>, #tpu.dimension_semantics<arbitrary>], iteration_bounds = array<i64: 2, 1>, scalar_prefetch = 0 : i64, scratch_operands = 1 : i64, tpu.core_type = #tpu.core_type<tc>, window_params = [{transform_indices = @transform_0, window_bounds = array<i64: 8, 128>}, {transform_indices = @transform_1, window_bounds = array<i64: 8, 128>}, {transform_indices = @transform_2, window_bounds = array<i64: 1, 8, 128>}]} {
    %c0_i32 = arith.constant 0 : i32
    %0 = arith.cmpi eq, %arg1, %c0_i32 : i32
    %1 = arith.extui %0 : i1 to i32
    %c0_i32_0 = arith.constant 0 : i32
    %2 = arith.cmpi ne, %1, %c0_i32_0 : i32
    scf.if %2 {
      %cst = arith.constant 0.000000e+00 : f32
      %13 = vector.broadcast %cst : f32 to vector<8x128xf32>
      %c0_10 = arith.constant 0 : index
      %c0_11 = arith.constant 0 : index
      %14 = vector.load %arg5[%c0_10, %c0_11] : memref<8x128xf32, #tpu.memory_space<vmem>>, vector<8x128xf32>
      tpu.vector_store %arg5[%c0_10, %c0_11], %13 {strides = array<i32>} : memref<8x128xf32, #tpu.memory_space<vmem>>, vector<8x128xf32>,
    } else {
    }
    %c0 = arith.constant 0 : index
    %c0_1 = arith.constant 0 : index
    %3 = vector.load %arg2[%c0, %c0_1] : memref<8x128xf32, #tpu.memory_space<vmem>>, vector<8x128xf32>
    %c0_2 = arith.constant 0 : index
    %c0_3 = arith.constant 0 : index
    %4 = vector.load %arg3[%c0_2, %c0_3] : memref<8x128xf32, #tpu.memory_space<vmem>>, vector<8x128xf32>
    %5 = arith.subf %3, %4 : vector<8x128xf32>
    %c0_4 = arith.constant 0 : index
    %c0_5 = arith.constant 0 : index
    %6 = vector.load %arg5[%c0_4, %c0_5] : memref<8x128xf32, #tpu.memory_space<vmem>>, vector<8x128xf32>
    %7 = math.absf %5 : vector<8x128xf32>
    %8 = arith.addf %6, %7 : vector<8x128xf32>
    %c0_6 = arith.constant 0 : index
    %c0_7 = arith.constant 0 : index
    %9 = vector.load %arg5[%c0_6, %c0_7] : memref<8x128xf32, #tpu.memory_space<vmem>>, vector<8x128xf32>
    tpu.vector_store %arg5[%c0_6, %c0_7], %8 {strides = array<i32>} : memref<8x128xf32, #tpu.memory_space<vmem>>, vector<8x128xf32>,
    %c0_i32_8 = arith.constant 0 : i32
    %10 = arith.cmpi eq, %arg1, %c0_i32_8 : i32
    %11 = arith.extui %10 : i1 to i32
    %c0_i32_9 = arith.constant 0 : i32
    %12 = arith.cmpi ne, %11, %c0_i32_9 : i32
    scf.if %12 {
      %c0_10 = arith.constant 0 : index
      %c0_11 = arith.constant 0 : index
      %13 = vector.load %arg5[%c0_10, %c0_11] : memref<8x128xf32, #tpu.memory_space<vmem>>, vector<8x128xf32>
      %14 = vector.shape_cast %13 : vector<8x128xf32> to vector<1x8x128xf32>
      %cst = arith.constant dense<0.000000e+00> : vector<1xf32>
      %15 = vector.multi_reduction <add>, %14, %cst [1, 2] : vector<1x8x128xf32> to vector<1xf32>
      %16 = vector.shape_cast %15 : vector<1xf32> to vector<1x1x1xf32>
      %17 = vector.extract %16[0, 0, 0] : f32 from vector<1x1x1xf32>
      %18 = vector.broadcast %17 : f32 to vector<1x8x128xf32>
      %c0_12 = arith.constant 0 : index
      %c0_13 = arith.constant 0 : index
      %c0_14 = arith.constant 0 : index
      %19 = vector.load %arg4[%c0_12, %c0_13, %c0_14] : memref<1x8x128xf32, #tpu.memory_space<vmem>>, vector<1x8x128xf32>
      tpu.vector_store %arg4[%c0_12, %c0_13, %c0_14], %18 {strides = array<i32>} : memref<1x8x128xf32, #tpu.memory_space<vmem>>, vector<1x8x128xf32>,
    } else {
    }
    return
  }
  func.func @transform_0(%arg0: i32, %arg1: i32) -> (i32, i32) {
    %c1_i32 = arith.constant 1 : i32
    %0 = arith.muli %arg0, %c1_i32 : i32
    %1 = arith.addi %0, %arg1 : i32
    %c0_i32 = arith.constant 0 : i32
    %c0_i32_0 = arith.constant 0 : i32
    return %1, %c0_i32 : i32, i32
  }
  func.func @transform_1(%arg0: i32, %arg1: i32) -> (i32, i32) {
    %c1_i32 = arith.constant 1 : i32
    %0 = arith.muli %arg0, %c1_i32 : i32
    %1 = arith.addi %0, %arg1 : i32
    %c0_i32 = arith.constant 0 : i32
    %c0_i32_0 = arith.constant 0 : i32
    return %1, %c0_i32 : i32, i32
  }
  func.func @transform_2(%arg0: i32, %arg1: i32) -> (i32, i32, i32) {
    %c0_i32 = arith.constant 0 : i32
    %c0_i32_0 = arith.constant 0 : i32
    %c0_i32_1 = arith.constant 0 : i32
    return %arg0, %c0_i32, %c0_i32_0 : i32, i32, i32
  }
}

</mosaic_0001>

<bundles_post_ra>
// kernel: tpu_custom_call.1
= control target key start
LH: loop header
LB: loop body
LE: loop exit
PB: predicated region body
PF: predicated region fallthrough
CT: control target
= control target key end

     0   :  { %7 = vsyncpa [#allocation4], 0  ;;  %s777_s0 = inlined_call_operand.hbm [shape: f32[16,128], index: 0, kind: input, shape index: {}]   ;;  %s778_s1 = inlined_call_operand.hbm [shape: f32[16,128], index: 1, kind: input, shape index: {}]   ;;  %s779_s2 = inlined_call_operand.hbm [shape: f32[2,8,128], index: 2, kind: output, shape index: {}]  }
   0x1   :  { %9 = vsyncpa [#allocation4 + $0x1], 0 }
   0x2   :  { %10 = vsyncpa [#allocation7], 0 }
   0x3   :  { %12 = vsyncpa [#allocation7 + $0x1], 0 }
   0x4   :  { %13 = vsyncpa [#allocation5], 0 }
   0x5   :  { %15 = vsyncpa [#allocation5 + $0x1], 0  ;;  %s605_s9 = smov 0   ;;  %s607_s10 = smov 0  }
   0x6   :  { %s609_s11 = smov 0   ;;  %s611_s12 = smov 0  }
   0x7   :  { %s613_s13 = smov 0   ;;  %s615_s14 = smov 0  }
   0x8 LB: > { %s360_s15 = sadd.s32 4294967295, %s585_s14   ;;  %s361_s16 = sadd.s32 4294967294, %s585_s14   ;;  %s585_s14 = sphi %s615_s14, %s21_s14   ;;  %s581_s13 = sphi %s613_s13, %s791_s13   ;;  %s577_s12 = sphi %s611_s12, %s790_s12   ;;  %s573_s11 = sphi %s609_s11, %s789_s11   ;;  %s569_s10 = sphi %s607_s10, %s788_s10   ;;  %s565_s9 = sphi %s605_s9, %s787_s9  }
   0x9   : > { %s33_s17 = sadd.s32 1, %s581_s13  ;;  %s42_s18 = sadd.s32 1, %s573_s11 }
   0xa   : > { %p35_p0 = scmp.ge.s32.totalorder %s33_s17, 2  ;;  %p49_p1 = scmp.ne.s32.totalorder %s573_s11, %s569_s10 }
   0xb   : > { %p50_p2 = scmp.eq.s32.totalorder %s585_s14, 0  ;;  %p55_p3 = scmp.ne.s32.totalorder %s569_s10, %s565_s9 }
   0xc   : > { %s793_s17 = smov (%p35_p0, %s33_s17), 0  ;;  %p56_p5 = scmp.eq.s32.totalorder %s360_s15, 0 }
   0xd   : > { %p646_p4 = por %p50_p2, %p49_p1  ;;  %s39_s20 = ssub.s32 %s581_s13, %s793_s17 }
   0xe   : > { %p107_p6 = scmp.eq.s32.totalorder %s360_s15, 1  ;;  %p40_p7 = scmp.eq.s32.totalorder %s39_s20, 0 }
   0xf   : > { %p652_p8 = por %p56_p5, %p55_p3  ;;  %p113_p10 = scmp.eq.s32.totalorder %s361_s16, 1 }
  0x10   : > { %p656_p9 = por %p107_p6, %p49_p1  ;;  %p395_p13 = scmp.lt.s32.totalorder %s585_s14, 2 }
  0x11   : > { %s661_s23 = scalar_select %p40_p7, %s573_s11, %s42_s18  }
  0x12   : > { %p663_p11 = por %p113_p10, %p55_p3  ;;  %s670_s25 = sand.u32 1, %s573_s11  }
  0x13   : > { %s364_s26 = sshll.u32 %s670_s25, 3  ;;  %s365_s27 = sshll.u32 %s581_s13, 7 }
  0x14   : > { %s143_s30 = scalar_lea.hbm %s777_s0, %s365_s27  ;;  %s137_s3 = scalar_lea.vmem [#allocation3], %s364_s26 }
  0x15   : > { %s145_s4 = sshll.u32 %s137_s3, 4  ;;  %p679_p0 = pnand %p395_p13, %p646_p4  ;;  %s146_s4 = int_to_ptr.vmem [resolvable:$true] %s145_s4 }
  0x16   : > { %p368_p1 = scmp.ge.s32.totalorder %s585_s14, 1  ;;  %p169_p2 = scmp.lt.s32.totalorder %s585_s14, 3 }
  0x17   : > { %s134_s6 = scalar_lea.sflag [#allocation4], %s670_s25  ;;  %p447_p3 = pneg %p679_p0 }
  0x18   : > { %s458_s7 = scalar_lea.vmem %s146_s4, 128  ;;  %s587_s8 = smov [#allocation3]  }
  0x19   : > { %p459_p5 = scmp.ne.s32.totalorder %s146_s4, %s458_s7  ;;  %s463_s15 = sshll.u32 %s587_s8, 4  ;;  %s464_s15 = int_to_ptr.vmem [resolvable:$false] %s463_s15 }
  0x1a   : > { %s465_s16 = scalar_lea.vmem %s464_s15, 256  ;;  %p466_p4 = scmp.lt.s32.totalorder %s146_s4, %s464_s15 }
  0x1b   : > { %p461_p6 = pnand %p459_p5, %p447_p3  ;;  %p467_p10 = scmp.lt.s32.totalorder %s465_s16, %s458_s7 }
  0x1d   : > { %p462_p7 = pneg %p461_p6  ;;  %p468_p13 = por %p467_p10, %p466_p4 }
  0x1f   : > { %p469_p12 = pnand %p468_p13, %p462_p7 }
  0x21   : > { %472 = shalt.err (!%p469_p12)
}
  0x22   : > { %387 = dma.hbm_to_vmem [thread:$0]  (!%p679_p0), %s143_s30, 128, %s146_s4, %s134_s6  }
  0x23   : > { %p697_p5 = pnand %p368_p1, %p169_p2  ;;  %s162_s28 = scalar_lea.hbm %s778_s1, %s365_s27 }
  0x24   : > { %s156_s29 = scalar_lea.vmem [#allocation6], %s364_s26  ;;  %s153_s7 = scalar_lea.sflag [#allocation7], %s670_s25 }
  0x25   : > { %s164_s3 = sshll.u32 %s156_s29, 4  ;;  %s588_s30 = smov [#allocation6]   ;;  %s165_s3 = int_to_ptr.vmem [resolvable:$true] %s164_s3 }
  0x26   : > { %s486_s8 = scalar_lea.vmem %s165_s3, 128  ;;  %s491_s4 = sshll.u32 %s588_s30, 4  ;;  %s492_s4 = int_to_ptr.vmem [resolvable:$false] %s491_s4 }
  0x27   : > { %p487_p12 = scmp.ne.s32.totalorder %s165_s3, %s486_s8  ;;  %s493_s6 = scalar_lea.vmem %s492_s4, 256 }
  0x28   : > { %p494_p1 = scmp.lt.s32.totalorder %s165_s3, %s492_s4  ;;  %p495_p2 = scmp.lt.s32.totalorder %s493_s6, %s486_s8 }
  0x29   : > { %p489_p6 = pnand %p487_p12, %p447_p3 }
  0x2a   : > { %p496_p4 = por %p495_p2, %p494_p1 }
  0x2b   : > { %p490_p7 = pneg %p489_p6 }
  0x2d   : > { %p497_p10 = pnand %p496_p4, %p490_p7 }
  0x2f   : > { %500 = shalt.err (!%p497_p10)
}
  0x30   : > { %390 = dma.hbm_to_vmem [thread:$0]  (!%p679_p0), %s162_s28, 128, %s165_s3, %s153_s7  }
  0x31   : > { %173 = sbr.rel (%p697_p5) target bundleno = 276 (0x114), region = 28  ;;  %s713_s25 = sand.u32 (!%p697_p5), 1, %s569_s10  }
  0x32   : > { %s716_s26 = sshll.u32 (!%p697_p5), %s713_s25, 3  ;;  %s176_s27 = scalar_lea.sflag (!%p697_p5), [#allocation4], %s713_s25 }
  0x33   : > { %s179_s15 = scalar_lea.vmem (!%p697_p5), [#allocation3], %s716_s26 }
  0x36   : > { %552 = dma.done.wait (%p652_p8), %s176_s27, 128  }
  0x37   : > { %554 = vsyncadd (%p652_p8), %s176_s27, 4294967168  ;;  %s185_s5 = scalar_lea.sflag [#allocation7], %s713_s25  ;;  %s188_s16 = scalar_lea.vmem [#allocation6], %s716_s26 }
  0x38   : > { %556 = dma.done.wait (%p652_p8), %s185_s5, 128  }
  0x39   : > { %558 = vsyncadd (%p652_p8), %s185_s5, 4294967168  ;;  %v221_v0 = vld [vmem:[%s179_s15] sm:$0xff]  ;;  %v222_v1 = vld [vmem:[%s188_s16] sm:$0xff]  ;;  %s213_s18 = scalar_lea.vmem [#allocation8], %s716_s26  ;;  %s373_s19 = sshll.u32 %s577_s12, 7 }
  0x3a   : > { %v223_v2 = vsub.f32 %v221_v0, %v222_v1  ;;  %s257_s21 = sshll.u32 %s213_s18, 4  ;;  %s255_s3 = scalar_lea.hbm %s779_s2, %s373_s19  ;;  %s732_s21 = int_to_ptr.vmem [resolvable:$true] %s257_s21 }
  0x3b   : > { %s244_s7 = scalar_lea.sflag [#allocation5], %s713_s25  ;;  %s501_s8 = scalar_lea.vmem %s732_s21, 128 }
  0x3c   : > { %v225_v3 = vand.u32 2147483647, %v223_v2  ;;  %p502_p8 = scmp.ne.s32.totalorder %s732_s21, %s501_s8  ;;  %s589_s30 = smov [#allocation8]  }
  0x3d   : > { %s505_s12 = sshll.u32 %s589_s30, 4  ;;  %s506_s12 = int_to_ptr.vmem [resolvable:$false] %s505_s12 }
  0x3e   : > { %232 = vadd.xlane.f32.xlu0 %v225_v3  ;;  %p503_p0 = pnand %p502_p8, %p656_p9  ;;  %s507_s4 = scalar_lea.vmem %s506_s12, 256 }
  0x3f   : > { %p508_p13 = scmp.lt.s32.totalorder %s732_s21, %s506_s12  ;;  %p509_p5 = scmp.lt.s32.totalorder %s507_s4, %s501_s8 }
  0x40   : > { %p504_p3 = pneg %p503_p0 }
  0x41   : > { %p510_p12 = por %p509_p5, %p508_p13 }
  0x43   : > { %p511_p6 = pnand %p510_p12, %p504_p3 }
  0xc7   : > { %v233_v4 = vpop.xlane.xlu0 %232 }
  0xc8   : > { %v234_v5 = vrot.slane %v233_v4, 4 }
  0xca   : > { %v235_v6 = vadd.f32 %v234_v5, %v233_v4 }
  0xcc   : > { %v236_v7 = vrot.slane %v235_v6, 2 }
  0xce   : > { %v237_v8 = vadd.f32 %v236_v7, %v235_v6 }
  0xd0   : > { %v238_v9 = vrot.slane %v237_v8, 1 }
  0xd2   : > { %v239_v10 = vadd.f32 %v238_v9, %v237_v8 }
  0xd4   : > { %376 = vpush %v239_v10 }
 0x105   : > { %s377_s20 = spop %376 }
 0x106   : > { %v241_v11 = vstv %s377_s20 }
 0x107   : > { %242 = vst [vmem:[%s213_s18] sm:$0xff] %v241_v11 }
 0x108   : > { %514 = shalt.err (!%p511_p6)
}
 0x109   : > { %s515_s6 = scalar_lea.hbm %s255_s3, 128  ;;  %s519_s27 = scalar_lea.hbm %s779_s2, 256 }
 0x10a   : > { %p516_p7 = scmp.ne.s32.totalorder %s255_s3, %s515_s6  ;;  %p520_p4 = scmp.lt.s32.totalorder %s255_s3, %s779_s2 }
 0x10b   : > { %p521_p10 = scmp.lt.s32.totalorder %s519_s27, %s515_s6 }
 0x10c   : > { %p517_p1 = pnand %p516_p7, %p656_p9 }
 0x10d   : > { %p522_p8 = por %p521_p10, %p520_p4 }
 0x10e   : > { %p518_p2 = pneg %p517_p1 }
 0x110   : > { %p523_p0 = pnand %p522_p8, %p518_p2 }
 0x112   : > { %526 = shalt.err (!%p523_p0)
}
 0x113   : > { %382 = dma.vmem_to_hbm [thread:$0]  (%p656_p9), %s732_s21, 128, %s255_s3, %s244_s7  }
 0x114 PF: > { %s269_s16 = sand.u32 1, %s565_s9   ;;  %p786_p3 = scmp.ge.s32.totalorder %s585_s14, 2 }
 0x115   : > { %s270_s18 = scalar_lea.sflag [#allocation5], %s269_s16 }
 0x116   : > { %p392_p13 = pnand %p786_p3, %p663_p11 }
 0x118   : > { %p393_p5 = pneg %p392_p13 }
 0x11a   : > { %560 = dma.done.wait (%p393_p5), %s270_s18, 128  }
 0x11b   : > { %562 = vsyncadd (%p393_p5), %s270_s18, 4294967168  ;;  %s21_s14 = sadd.s32 1, %s585_s14   ;;  %s787_s9 = smov %s569_s10 }
 0x11c   : > { %p18_p12 = scmp.ge.s32.totalorder %s21_s14, 4   ;;  %s788_s10 = smov %s573_s11 }
 0x11d   : > { %s789_s11 = smov %s661_s23  ;;  %s790_s12 = smov %s581_s13 }
 0x11e   : > { %s791_s13 = smov %s793_s17  ;;  %20 = sbr.rel (!%p18_p12) target bundleno = 8 (0x8), region = 94 }
 0x123   :  { %275 = vsyncpa [#allocation4], 1 }
 0x124   :  { %277 = vsyncpa [#allocation4 + $0x1], 1 }
 0x125   :  { %278 = vsyncpa [#allocation7], 1 }
 0x126   :  { %280 = vsyncpa [#allocation7 + $0x1], 1 }
 0x127   :  { %281 = vsyncpa [#allocation5], 1 }
 0x128   :  { %283 = vsyncpa [#allocation5 + $0x1], 1 }

</bundles_post_ra>
